<compile_context>
chip_gen: v6e
topology: v6e:2x2x1
jax: 0.10.0
libtpu: 0.0.40
codegen_flags: <defaults>
</compile_context>

<pallas_src>
import jax
import jax.numpy as jnp
from jax.experimental import pallas as pl
from jax.experimental.pallas import tpu as pltpu


def dot_mask_kernel(y_ref, w_ref, o_ref):
    """One grid step == one block of TB batch rows.

    y_ref : VMEM f32[TB, D+1]      (row mask already folded in; last col = bias keep)
    w_ref : VMEM f32[TB, (D+1)*H]  (row-major (D+1, H) flattened per sample)
    o_ref : VMEM f32[TB, H]
    """
    d1 = y_ref.shape[1]
    h = o_ref.shape[1]
    y = y_ref[...]
    w = w_ref[...]
    # d1 = D + 1 is a small static trace-time constant -> unrolled lane slices.
    acc = w[:, 0:h] * y[:, 0:1]
    for i in range(1, d1):
        acc = acc + w[:, i * h:(i + 1) * h] * y[:, i:i + 1]
    o_ref[...] = jnp.tanh(acc)


def _choose_block_rows(B, d1, H):
    """Pick TB from the lane-padded per-row VMEM footprint (f32)."""
    lane = lambda n: -(-n // 128) * 128
    per_row_bytes = 4 * (lane(d1) + lane(d1 * H) + lane(H))
    # ~12 MiB total of double-buffered blocks (2x per-block footprint).
    budget_rows = max(8, (((6 << 20) // per_row_bytes) // 8) * 8)
    tb = min(B, budget_rows)
    if B >= 16:
        # Keep at least 2 grid steps so dimension_semantics=("parallel",) can
        # split the batch across the two TensorCores on v7x.
        tb = min(tb, max(8, ((-(-B // 2)) // 8) * 8))
    if tb < B and tb % 8 != 0:
        tb = max(8, (tb // 8) * 8)  # (8,128) sublane rule unless block == full dim
    return tb


def dot_mask_forward(X, AUX, K, *, block_b=None):
    """Pallas implementation of DotMaskLayer.forward."""
    B, D = X.shape
    d1 = D + 1
    assert AUX.shape[0] == B and AUX.shape[1] % d1 == 0
    H = AUX.shape[1] // d1
    M = D // 2

    # Fold the K-dependent row-keep mask into Y here (a tiny (B, D+1)
    # elementwise XLA op).  Rows are zeroed iff r in [k, M) or r >= M + k —
    # exactly the two PyTorch slice assignments (k == 0 zeroes everything, so
    # the output row is tanh(0) = 0, matching the module).
    r = jnp.arange(d1, dtype=jnp.int32)[None, :]
    k = K.astype(jnp.int32).reshape(B, 1)
    keep = jnp.where(((r >= k) & (r < M)) | (r >= M + k), 0.0, 1.0)
    Y = jnp.concatenate(
        [X.astype(jnp.float32), jnp.ones((B, 1), jnp.float32)], axis=1) * keep

    # AUX is already the dense per-sample (D+1, H) row-major flattening.
    W = AUX.astype(jnp.float32)
    # TODO(synk): optionally stream W/Y as bfloat16 (halves the dominant HBM
    # stream) once a relaxed-tolerance accuracy gate is in place.

    tb = block_b if block_b is not None else _choose_block_rows(B, d1, H)
    tb = min(int(tb), B)
    if tb < B and tb % 8 != 0:
        tb = max(8, (tb // 8) * 8)
    n_blocks = pl.cdiv(B, tb)  # ragged tail: OOB writes are masked by Pallas

    out = pl.pallas_call(
        dot_mask_kernel,
        out_shape=jax.ShapeDtypeStruct((B, H), jnp.float32),
        grid=(n_blocks,),
        in_specs=[
            pl.BlockSpec((tb, d1), lambda b: (b, 0)),        # Y (mask folded in)
            pl.BlockSpec((tb, d1 * H), lambda b: (b, 0)),    # W / AUX, lane-dense
        ],
        out_specs=pl.BlockSpec((tb, H), lambda b: (b, 0)),
        compiler_params=pltpu.CompilerParams(
            # Batch-block axis is fully independent -> shard across the two
            # TensorCores on v7x; no-op on v5e/v6e.
            dimension_semantics=("parallel",)),
    )(Y, W)
    return out


def dot_mask_reference(X, AUX, K):
    """Pure-JAX reference mirroring the PyTorch loop, for verification."""
    B, D = X.shape
    d1 = D + 1
    H = AUX.shape[1] // d1
    M = D // 2
    outs = []
    for ii in range(B):
        W = AUX[ii].reshape(d1, H)
        idx = int(K[ii])
        r = jnp.arange(d1)[:, None]
        zero_rows = ((r >= idx) & (r < M)) | (r >= M + idx)
        Wm = jnp.where(zero_rows, 0.0, W)
        Y = jnp.concatenate([X[ii], jnp.ones((1,), X.dtype)])
        outs.append(jnp.tanh(Y @ Wm))
    return jnp.stack(outs)


if __name__ == "__main__":
    key = jax.random.PRNGKey(0)
    kx, ka, kk = jax.random.split(key, 3)

    # Small config matching the module: B=2, D=4 (M=2, D+1=5), H=8.
    B, D, H = 2, 4, 8
    X = jax.random.normal(kx, (B, D), dtype=jnp.float32)
    AUX = jax.random.normal(ka, (B, (D + 1) * H), dtype=jnp.float32)
    K = jax.random.randint(kk, (B,), 0, D // 2 + 1, dtype=jnp.int32)

    out = jax.block_until_ready(dot_mask_forward(X, AUX, K))
    ref = dot_mask_reference(X, AUX, K)
    assert out.shape == (B, H)
    assert jnp.allclose(out, ref, atol=1e-5, rtol=1e-5), "mismatch vs reference"

    # Second config exercising the multi-block + ragged-tail path (grid > 1,
    # B not divisible by TB, no wrapper-side padding of AUX).
    B2, D2, H2 = 13, 6, 16
    kx2, ka2, kk2 = jax.random.split(jax.random.PRNGKey(1), 3)
    X2 = jax.random.normal(kx2, (B2, D2), dtype=jnp.float32)
    AUX2 = jax.random.normal(ka2, (B2, (D2 + 1) * H2), dtype=jnp.float32)
    K2 = jax.random.randint(kk2, (B2,), 0, D2 // 2 + 1, dtype=jnp.int32)
    out2 = jax.block_until_ready(dot_mask_forward(X2, AUX2, K2, block_b=8))
    ref2 = dot_mask_reference(X2, AUX2, K2)
    assert out2.shape == (B2, H2)
    assert jnp.allclose(out2, ref2, atol=1e-5, rtol=1e-5), "mismatch vs reference (blocked)"

    print("KERNEL_OK")
</pallas_src>

<mosaic_0001>
module attributes {stable_mosaic.version = 11 : i64} {
  func.func @dot_mask_kernel(%arg0: i32, %arg1: memref<2x5xf32, #tpu.memory_space<vmem>>, %arg2: memref<2x40xf32, #tpu.memory_space<vmem>>, %arg3: memref<2x8xf32, #tpu.memory_space<vmem>>) attributes {dimension_semantics = [#tpu.dimension_semantics<parallel>], iteration_bounds = array<i64: 1>, scalar_prefetch = 0 : i64, scratch_operands = 0 : i64, tpu.core_type = #tpu.core_type<tc>, window_params = [{transform_indices = @transform_0, window_bounds = array<i64: 2, 5>}, {transform_indices = @transform_1, window_bounds = array<i64: 2, 40>}, {transform_indices = @transform_2, window_bounds = array<i64: 2, 8>}]} {
    %c0 = arith.constant 0 : index
    %c0_0 = arith.constant 0 : index
    %0 = vector.load %arg1[%c0, %c0_0] : memref<2x5xf32, #tpu.memory_space<vmem>>, vector<2x5xf32>
    %c0_1 = arith.constant 0 : index
    %c0_2 = arith.constant 0 : index
    %1 = vector.load %arg2[%c0_1, %c0_2] : memref<2x40xf32, #tpu.memory_space<vmem>>, vector<2x40xf32>
    %2 = vector.extract_strided_slice %1 {offsets = [0, 0], sizes = [2, 8], strides = [1, 1]} : vector<2x40xf32> to vector<2x8xf32>
    %3 = vector.extract_strided_slice %0 {offsets = [0, 0], sizes = [2, 1], strides = [1, 1]} : vector<2x5xf32> to vector<2x1xf32>
    %4 = vector.broadcast %3 : vector<2x1xf32> to vector<2x8xf32>
    %5 = arith.mulf %2, %4 : vector<2x8xf32>
    %6 = vector.extract_strided_slice %1 {offsets = [0, 8], sizes = [2, 8], strides = [1, 1]} : vector<2x40xf32> to vector<2x8xf32>
    %7 = vector.extract_strided_slice %0 {offsets = [0, 1], sizes = [2, 1], strides = [1, 1]} : vector<2x5xf32> to vector<2x1xf32>
    %8 = vector.broadcast %7 : vector<2x1xf32> to vector<2x8xf32>
    %9 = arith.mulf %6, %8 : vector<2x8xf32>
    %10 = arith.addf %5, %9 : vector<2x8xf32>
    %11 = vector.extract_strided_slice %1 {offsets = [0, 16], sizes = [2, 8], strides = [1, 1]} : vector<2x40xf32> to vector<2x8xf32>
    %12 = vector.extract_strided_slice %0 {offsets = [0, 2], sizes = [2, 1], strides = [1, 1]} : vector<2x5xf32> to vector<2x1xf32>
    %13 = vector.broadcast %12 : vector<2x1xf32> to vector<2x8xf32>
    %14 = arith.mulf %11, %13 : vector<2x8xf32>
    %15 = arith.addf %10, %14 : vector<2x8xf32>
    %16 = vector.extract_strided_slice %1 {offsets = [0, 24], sizes = [2, 8], strides = [1, 1]} : vector<2x40xf32> to vector<2x8xf32>
    %17 = vector.extract_strided_slice %0 {offsets = [0, 3], sizes = [2, 1], strides = [1, 1]} : vector<2x5xf32> to vector<2x1xf32>
    %18 = vector.broadcast %17 : vector<2x1xf32> to vector<2x8xf32>
    %19 = arith.mulf %16, %18 : vector<2x8xf32>
    %20 = arith.addf %15, %19 : vector<2x8xf32>
    %21 = vector.extract_strided_slice %1 {offsets = [0, 32], sizes = [2, 8], strides = [1, 1]} : vector<2x40xf32> to vector<2x8xf32>
    %22 = vector.extract_strided_slice %0 {offsets = [0, 4], sizes = [2, 1], strides = [1, 1]} : vector<2x5xf32> to vector<2x1xf32>
    %23 = vector.broadcast %22 : vector<2x1xf32> to vector<2x8xf32>
    %24 = arith.mulf %21, %23 : vector<2x8xf32>
    %25 = arith.addf %20, %24 : vector<2x8xf32>
    %26 = math.tanh %25 : vector<2x8xf32>
    %c0_3 = arith.constant 0 : index
    %c0_4 = arith.constant 0 : index
    %27 = vector.load %arg3[%c0_3, %c0_4] : memref<2x8xf32, #tpu.memory_space<vmem>>, vector<2x8xf32>
    tpu.vector_store %arg3[%c0_3, %c0_4], %26 {strides = array<i32>} : memref<2x8xf32, #tpu.memory_space<vmem>>, vector<2x8xf32>,
    return
  }
  func.func @transform_0(%arg0: i32) -> (i32, i32) {
    %c0_i32 = arith.constant 0 : i32
    %c0_i32_0 = arith.constant 0 : i32
    return %arg0, %c0_i32 : i32, i32
  }
  func.func @transform_1(%arg0: i32) -> (i32, i32) {
    %c0_i32 = arith.constant 0 : i32
    %c0_i32_0 = arith.constant 0 : i32
    return %arg0, %c0_i32 : i32, i32
  }
  func.func @transform_2(%arg0: i32) -> (i32, i32) {
    %c0_i32 = arith.constant 0 : i32
    %c0_i32_0 = arith.constant 0 : i32
    return %arg0, %c0_i32 : i32, i32
  }
}

</mosaic_0001>

<bundles_post_ra>
// kernel: tpu_custom_call.1
= control target key start
LH: loop header
LB: loop body
LE: loop exit
PB: predicated region body
PF: predicated region fallthrough
CT: control target
= control target key end

     0   :  { %7 = vsyncpa [#allocation3], 0  ;;  %s225_s0 = inlined_call_operand.hbm [shape: f32[2,5], index: 0, kind: input, shape index: {}]   ;;  %s226_s1 = inlined_call_operand.hbm [shape: f32[2,40], index: 1, kind: input, shape index: {}]   ;;  %s227_s2 = inlined_call_operand.hbm [shape: f32[2,8], index: 2, kind: output, shape index: {}]  }
   0x1   :  { %8 = vsyncpa [#allocation6], 0 }
   0x2   :  { %9 = vsyncpa [#allocation4], 0  ;;  %s189_s9 = smov [#allocation2]   ;;  %s190_s11 = smov [#allocation5]  }
   0x3   :  { %s16_s10 = sshll.u32 %s189_s9, 4  ;;  %s26_s12 = sshll.u32 %s190_s11, 4  ;;  %s17_s10 = int_to_ptr.vmem [resolvable:$true] %s16_s10  ;;  %s27_s12 = int_to_ptr.vmem [resolvable:$true] %s26_s12 }
   0x4   :  { %s131_s13 = scalar_lea.vmem %s17_s10, 32  ;;  %p136_p1 = scmp.lt.s32.totalorder %s17_s10, %s17_s10 }
   0x5   :  { %p132_p0 = scmp.ne.s32.totalorder %s17_s10, %s131_s13  ;;  %p137_p2 = scmp.lt.s32.totalorder %s131_s13, %s131_s13 }
   0x7   :  { %p138_p3 = por %p137_p2, %p136_p1 }
   0x9   :  { %p139_p4 = pnand %p138_p3, %p132_p0 }
   0xb   :  { %142 = shalt.err (!%p139_p4)
}
   0xc   :  { %19 = dma.hbm_to_vmem [thread:$0]  %s225_s0, 32, %s17_s10, [#allocation3]  }
   0xd   :  { %s151_s16 = scalar_lea.vmem %s27_s12, 32  ;;  %p156_p6 = scmp.lt.s32.totalorder %s27_s12, %s27_s12 }
   0xe   :  { %p152_p5 = scmp.ne.s32.totalorder %s27_s12, %s151_s16  ;;  %p157_p7 = scmp.lt.s32.totalorder %s151_s16, %s151_s16 }
  0x10   :  { %p158_p8 = por %p157_p7, %p156_p6 }
  0x12   :  { %p159_p9 = pnand %p158_p8, %p152_p5 }
  0x14   :  { %162 = shalt.err (!%p159_p9)
}
  0x15   :  { %29 = dma.hbm_to_vmem [thread:$0]  %s226_s1, 32, %s27_s12, [#allocation6]  }
  0x16   :  { %183 = dma.done.wait [#allocation3], 32  }
  0x17   :  { %184 = vsyncadd [#allocation3], 4294967264 }
  0x18   :  { %185 = dma.done.wait [#allocation6], 32  }
  0x19   :  { %186 = vsyncadd [#allocation6], 4294967264  ;;  %v191_v0 = vmov 1   ;;  %v192_v1 = vmov 3   ;;  %v36_v2 = vld [vmem:[#allocation2] sm:$0x3] }
  0x1a   :  { %115 = vset.pattern.permute.xlu0 %v191_v0  ;;  %117 = vset.pattern.permute.xlu1 %v192_v1  ;;  %v193_v3 = vmov 2   ;;  %v194_v4 = vmov 4   ;;  %v195_v5 = vmov 0   ;;  %v37_v6 = vld [vmem:[#allocation5] sm:$0x3]  ;;  %s196_s0 = smov 120  }
  0x1b   :  { %45 = vperm.xlu0 %115, %v36_v2   ;;  %65 = vperm.xlu1 %117, %v36_v2   ;;  %s197_s1 = smov 104   ;;  %s198_s19 = smov 112   ;;  %vm85_vm0 = vcmask 58368  }
  0x1c   :  { %s199_s20 = smov 96   ;;  %s200_s21 = smov [#allocation7]  }
  0x1d   :  { %s93_s22 = sshll.u32 %s200_s21, 4  ;;  %s94_s22 = int_to_ptr.vmem [resolvable:$true] %s93_s22 }
  0x1e   :  { %s163_s23 = scalar_lea.vmem %s94_s22, 32  ;;  %p168_p11 = scmp.lt.s32.totalorder %s94_s22, %s94_s22 }
  0x1f   :  { %116 = vset.pattern.permute.xlu0 %v193_v3  ;;  %118 = vset.pattern.permute.xlu1 %v194_v4  ;;  %p164_p10 = scmp.ne.s32.totalorder %s94_s22, %s163_s23  ;;  %p169_p12 = scmp.lt.s32.totalorder %s163_s23, %s163_s23 }
  0x20   :  { %55 = vperm.xlu0 %116, %v36_v2   ;;  %75 = vperm.xlu1 %118, %v36_v2  }
  0x21   :  { %p170_p13 = por %p169_p12, %p168_p11 }
  0x23   :  { %p171_p0 = pnand %p170_p13, %p164_p10 }
  0x24   :  { %119 = vset.pattern.permute.xlu1 %v195_v5  ;;  %120 = vset.pattern.permute.xlu0 %v194_v4 }
  0x25   :  { %40 = vperm.xlu1 %119, %v36_v2  }
  0x96   :  { %v46_v7 = vpop.permute.xlu0 %45  ;;  %v66_v8 = vpop.permute.xlu1 %65 }
  0x97   :  { %v48_v9 = vmul.f32 %v46_v7, %v37_v6  ;;  %v68_v10 = vmul.f32 %v66_v8, %v37_v6 }
  0x99   :  { %50 = vrot.lane.b32.xlu0 %v48_v9, %s196_s0 }
  0x9b   :  { %v56_v11 = vpop.permute.xlu0 %55  ;;  %v76_v12 = vpop.permute.xlu1 %75 }
  0x9c   :  { %v58_v13 = vmul.f32 %v56_v11, %v37_v6  ;;  %v78_v14 = vmul.f32 %v76_v12, %v37_v6 }
  0x9d   :  { %70 = vrot.lane.b32.xlu0 %v68_v10, %s197_s1 }
  0x9e   :  { %60 = vrot.lane.b32.xlu1 %v58_v13, %s198_s19 }
  0xa0   :  { %v41_v15 = vpop.permute.xlu1 %40 }
  0xa1   :  { %v43_v16 = vmul.f32 %v41_v15, %v37_v6 }
  0xa2   :  { %80 = vrot.lane.b32.xlu1 %v78_v14, %s199_s20 }
 0x10b   :  { %v51_v17 = vpop.permute.xlu0 %50 }
 0x10c   :  { %v53_v18 = vadd.f32 %v51_v17, %v43_v16 }
 0x10f   :  { %v71_v21 = vpop.permute.xlu0 %70 }
 0x110   :  { %v61_v19 = vpop.permute.xlu1 %60 }
 0x111   :  { %v63_v20 = vadd.f32 %v61_v19, %v53_v18 }
 0x113   :  { %v73_v22 = vadd.f32 %v71_v21, %v63_v20 }
 0x114   :  { %v81_v23 = vpop.permute.xlu1 %80 }
 0x115   :  { %v83_v24 = vadd.f32 %v81_v23, %v73_v22 }
 0x117   :  { %121 = vtanh.f32 %v83_v24 }
 0x124   :  { %v122_v25 = vpop.eup %121 }
 0x125   :  { %86 = vst.msk [vmem:[#allocation7] sm:$0x3] %vm85_vm0, %v122_v25 }
 0x126   :  { %174 = shalt.err (!%p171_p0)
}
 0x127   :  { %96 = dma.vmem_to_hbm [thread:$0]  %s94_s22, 32, %s227_s2, [#allocation4]  }
 0x128   :  { %187 = dma.done.wait [#allocation4], 32  }
 0x129   :  { %188 = vsyncadd [#allocation4], 4294967264 }
 0x12a   :  { %100 = vsyncpa [#allocation3], 1 }
 0x12b   :  { %101 = vsyncpa [#allocation6], 1 }
 0x12c   :  { %102 = vsyncpa [#allocation4], 1 }

</bundles_post_ra>
